<compile_context>
chip_gen: v7x
topology: tpu7x:2x2x1
jax: 0.10.0
libtpu: 0.0.40
codegen_flags: <defaults>
</compile_context>

<pallas_src>
import jax
import jax.numpy as jnp
import numpy as np
from jax.experimental import pallas as pl
from jax.experimental.pallas import tpu as pltpu


def pnn_kernel(lin_ref, srow_ref, scol_ref, w1a_ref, w1bx_ref, b1_ref,
               w2_ref, b2_ref, o_ref):
    lin = lin_ref[...]                                              # (Bt, F*E)

    # Pairwise gather as lane-dense MXU matmuls against static 0/1 selection
    # matrices (each column has exactly one 1 -> numerically exact gather).
    p = jnp.dot(lin, srow_ref[...], preferred_element_type=jnp.float32)  # (Bt, P*E)
    q = jnp.dot(lin, scol_ref[...], preferred_element_type=jnp.float32)  # (Bt, P*E)
    r = p * q                                                        # pair products

    # fc_1 on concat([linear_part, inner_product]) == lin @ W1a + r @ W1b_exp
    # (the sum over E is absorbed into the matmul via the E-repeated W1b).
    h = (jnp.dot(lin, w1a_ref[...], preferred_element_type=jnp.float32)
         + jnp.dot(r, w1bx_ref[...], preferred_element_type=jnp.float32)
         + b1_ref[...])                                              # (Bt, 2H)
    h = jnp.maximum(h, 0.0)                                          # ReLU

    out = jnp.dot(h, w2_ref[...],
                  preferred_element_type=jnp.float32) + b2_ref[...]  # (Bt, H)
    o_ref[...] = jnp.maximum(out, 0.0)                               # ReLU


def pnn_forward(x, emb_table, w1, b1, w2, b2, num_feature_field,
                batch_tile=256):
    """Replicates PNN.forward(x) (params=None branch)."""
    B = x.shape[0]
    F = num_feature_field
    E = emb_table.shape[1]
    H2 = w1.shape[0]          # hidden_dim * 2
    H = w2.shape[0]           # hidden_dim
    FE = F * E

    # --- static pair index lists (compile-time constants) ---------------------
    row, col = [], []
    for i in range(F - 1):
        for j in range(i + 1, F):
            row.append(i)
            col.append(j)
    P = len(row)
    PE = P * E

    # 0/1 selection matrices implementing the pair gathers on the MXU.
    srow_np = np.zeros((FE, PE), dtype=np.float32)
    scol_np = np.zeros((FE, PE), dtype=np.float32)
    eye = np.eye(E, dtype=np.float32)
    for k in range(P):
        srow_np[row[k] * E:(row[k] + 1) * E, k * E:(k + 1) * E] = eye
        scol_np[col[k] * E:(col[k] + 1) * E, k * E:(k + 1) * E] = eye
    srow = jnp.asarray(srow_np)
    scol = jnp.asarray(scol_np)

    # fc_1 weight split (PyTorch nn.Linear: y = x @ W.T + b).  The inner-product
    # half is E-repeated so the reduction over E folds into the matmul.
    w1a = w1[:, :FE].T                                   # (FE, 2H)
    w1b_exp = jnp.repeat(w1[:, FE:].T, E, axis=0)        # (P*E, 2H)
    w2t = w2.T                                           # (2H, H)
    b1r = b1.reshape(1, H2)
    b2r = b2.reshape(1, H)

    # --- glue (plain JAX): embedding lookup only ------------------------------
    # TODO(synk): the nn.Embedding gather stays in XLA; only (B, F*E) floats
    # are DMA'd into the kernel.
    lin = emb_table[x].reshape(B, FE)                    # (B, F*E)

    # --- batch tiling: sublane-dense, parallel grid ----------------------------
    Bt = batch_tile
    if B < Bt:
        Bt = max(8, pl.cdiv(B, 8) * 8)
    B_pad = pl.cdiv(B, Bt) * Bt
    if B_pad != B:
        lin = jnp.pad(lin, ((0, B_pad - B), (0, 0)))

    grid = (B_pad // Bt,)
    const = lambda i: (0, 0)

    out = pl.pallas_call(
        pnn_kernel,
        out_shape=jax.ShapeDtypeStruct((B_pad, H), jnp.float32),
        grid=grid,
        in_specs=[
            pl.BlockSpec((Bt, FE), lambda i: (i, 0)),    # activations: tiled on batch
            pl.BlockSpec((FE, PE), const),               # S_row   (resident)
            pl.BlockSpec((FE, PE), const),               # S_col   (resident)
            pl.BlockSpec((FE, H2), const),               # W1a     (resident)
            pl.BlockSpec((PE, H2), const),               # W1b_exp (resident)
            pl.BlockSpec((1, H2), const),                # b1      (resident)
            pl.BlockSpec((H2, H), const),                # W2.T    (resident)
            pl.BlockSpec((1, H), const),                 # b2      (resident)
        ],
        out_specs=pl.BlockSpec((Bt, H), lambda i: (i, 0)),
        compiler_params=pltpu.CompilerParams(
            dimension_semantics=("parallel",)),
    )(lin, srow, scol, w1a, w1b_exp, b1r, w2t, b2r)
    return out[:B]


def xavier_normal(key, shape):
    fan_out, fan_in = shape
    std = (2.0 / (fan_in + fan_out)) ** 0.5
    return std * jax.random.normal(key, shape, dtype=jnp.float32)


if __name__ == "__main__":
    # Small, deterministic configuration consistent with the module defaults.
    num_feature_field = 9
    arch_num = 32
    arch_embed_dim = 8
    hidden_dim = 32
    batch = 8

    num_pair = num_feature_field * (num_feature_field - 1) // 2
    product_out_dim = num_feature_field * arch_embed_dim + num_pair

    key = jax.random.PRNGKey(0)
    k_emb, k_w1, k_w2, k_x = jax.random.split(key, 4)

    # Deterministic parameter init mirroring _init_weights:
    #   Embedding / Linear weights: xavier_normal_, Linear biases: 0.
    emb_table = xavier_normal(k_emb, (arch_num, arch_embed_dim))
    w1 = xavier_normal(k_w1, (hidden_dim * 2, product_out_dim))
    b1 = jnp.zeros((hidden_dim * 2,), dtype=jnp.float32)
    w2 = xavier_normal(k_w2, (hidden_dim, hidden_dim * 2))
    b2 = jnp.zeros((hidden_dim,), dtype=jnp.float32)

    x = jax.random.randint(k_x, (batch, num_feature_field), 0, arch_num,
                           dtype=jnp.int32)

    out = pnn_forward(x, emb_table, w1, b1, w2, b2, num_feature_field)
    jax.block_until_ready(out)

    # Pure-JAX reference for sanity check (same math as PyTorch forward).
    feat_emb = emb_table[x]
    lin = feat_emb.reshape(batch, -1)
    row, col = [], []
    for i in range(num_feature_field - 1):
        for j in range(i + 1, num_feature_field):
            row.append(i)
            col.append(j)
    inner = jnp.sum(feat_emb[:, jnp.array(row)] * feat_emb[:, jnp.array(col)],
                    axis=-1)
    cat = jnp.concatenate([lin, inner], axis=1)
    ref = jnp.maximum(cat @ w1.T + b1, 0.0)
    ref = jnp.maximum(ref @ w2.T + b2, 0.0)

    assert out.shape == (batch, hidden_dim)
    assert jnp.allclose(out, ref, atol=1e-4, rtol=1e-4), \
        float(jnp.max(jnp.abs(out - ref)))
    print("KERNEL_OK")
</pallas_src>

<mosaic_0001>
module attributes {stable_mosaic.version = 11 : i64} {
  func.func @pnn_kernel(%arg0: i32, %arg1: memref<8x72xf32, #tpu.memory_space<vmem>>, %arg2: memref<72x288xf32, #tpu.memory_space<vmem>>, %arg3: memref<72x288xf32, #tpu.memory_space<vmem>>, %arg4: memref<72x64xf32, #tpu.memory_space<vmem>>, %arg5: memref<288x64xf32, #tpu.memory_space<vmem>>, %arg6: memref<1x64xf32, #tpu.memory_space<vmem>>, %arg7: memref<64x32xf32, #tpu.memory_space<vmem>>, %arg8: memref<1x32xf32, #tpu.memory_space<vmem>>, %arg9: memref<8x32xf32, #tpu.memory_space<vmem>>) attributes {dimension_semantics = [#tpu.dimension_semantics<parallel>], iteration_bounds = array<i64: 1>, scalar_prefetch = 0 : i64, scratch_operands = 0 : i64, tpu.core_type = #tpu.core_type<tc>, window_params = [{transform_indices = @transform_0, window_bounds = array<i64: 8, 72>}, {pipeline_mode = #tpu.pipeline_mode<synchronous>, transform_indices = @transform_1, window_bounds = array<i64: 72, 288>}, {pipeline_mode = #tpu.pipeline_mode<synchronous>, transform_indices = @transform_2, window_bounds = array<i64: 72, 288>}, {pipeline_mode = #tpu.pipeline_mode<synchronous>, transform_indices = @transform_3, window_bounds = array<i64: 72, 64>}, {pipeline_mode = #tpu.pipeline_mode<synchronous>, transform_indices = @transform_4, window_bounds = array<i64: 288, 64>}, {pipeline_mode = #tpu.pipeline_mode<synchronous>, transform_indices = @transform_5, window_bounds = array<i64: 1, 64>}, {pipeline_mode = #tpu.pipeline_mode<synchronous>, transform_indices = @transform_6, window_bounds = array<i64: 64, 32>}, {pipeline_mode = #tpu.pipeline_mode<synchronous>, transform_indices = @transform_7, window_bounds = array<i64: 1, 32>}, {transform_indices = @transform_8, window_bounds = array<i64: 8, 32>}]} {
    %c0 = arith.constant 0 : index
    %c0_0 = arith.constant 0 : index
    %0 = vector.load %arg1[%c0, %c0_0] : memref<8x72xf32, #tpu.memory_space<vmem>>, vector<8x72xf32>
    %c0_1 = arith.constant 0 : index
    %c0_2 = arith.constant 0 : index
    %1 = vector.load %arg2[%c0_1, %c0_2] : memref<72x288xf32, #tpu.memory_space<vmem>>, vector<72x288xf32>
    %cst = arith.constant dense<0.000000e+00> : vector<8x288xf32>
    %2 = tpu.matmul %0, %1, %cst {dimension_numbers = #tpu.dot_dimension_numbers<[1], [0], [0], [1], [0, 0, 1, 1], [], []>} : vector<8x72xf32>, vector<72x288xf32>, vector<8x288xf32> -> vector<8x288xf32>
    %c0_3 = arith.constant 0 : index
    %c0_4 = arith.constant 0 : index
    %3 = vector.load %arg3[%c0_3, %c0_4] : memref<72x288xf32, #tpu.memory_space<vmem>>, vector<72x288xf32>
    %cst_5 = arith.constant dense<0.000000e+00> : vector<8x288xf32>
    %4 = tpu.matmul %0, %3, %cst_5 {dimension_numbers = #tpu.dot_dimension_numbers<[1], [0], [0], [1], [0, 0, 1, 1], [], []>} : vector<8x72xf32>, vector<72x288xf32>, vector<8x288xf32> -> vector<8x288xf32>
    %5 = arith.mulf %2, %4 : vector<8x288xf32>
    %c0_6 = arith.constant 0 : index
    %c0_7 = arith.constant 0 : index
    %6 = vector.load %arg4[%c0_6, %c0_7] : memref<72x64xf32, #tpu.memory_space<vmem>>, vector<72x64xf32>
    %cst_8 = arith.constant dense<0.000000e+00> : vector<8x64xf32>
    %7 = tpu.matmul %0, %6, %cst_8 {dimension_numbers = #tpu.dot_dimension_numbers<[1], [0], [0], [1], [0, 0, 1, 1], [], []>} : vector<8x72xf32>, vector<72x64xf32>, vector<8x64xf32> -> vector<8x64xf32>
    %c0_9 = arith.constant 0 : index
    %c0_10 = arith.constant 0 : index
    %8 = vector.load %arg5[%c0_9, %c0_10] : memref<288x64xf32, #tpu.memory_space<vmem>>, vector<288x64xf32>
    %cst_11 = arith.constant dense<0.000000e+00> : vector<8x64xf32>
    %9 = tpu.matmul %5, %8, %cst_11 {dimension_numbers = #tpu.dot_dimension_numbers<[1], [0], [0], [1], [0, 0, 1, 1], [], []>} : vector<8x288xf32>, vector<288x64xf32>, vector<8x64xf32> -> vector<8x64xf32>
    %10 = arith.addf %7, %9 : vector<8x64xf32>
    %c0_12 = arith.constant 0 : index
    %c0_13 = arith.constant 0 : index
    %11 = vector.load %arg6[%c0_12, %c0_13] : memref<1x64xf32, #tpu.memory_space<vmem>>, vector<1x64xf32>
    %12 = vector.broadcast %11 : vector<1x64xf32> to vector<8x64xf32>
    %13 = arith.addf %10, %12 : vector<8x64xf32>
    %cst_14 = arith.constant 0.000000e+00 : f32
    %14 = vector.broadcast %cst_14 : f32 to vector<8x64xf32>
    %15 = arith.maximumf %13, %14 : vector<8x64xf32>
    %c0_15 = arith.constant 0 : index
    %c0_16 = arith.constant 0 : index
    %16 = vector.load %arg7[%c0_15, %c0_16] : memref<64x32xf32, #tpu.memory_space<vmem>>, vector<64x32xf32>
    %cst_17 = arith.constant dense<0.000000e+00> : vector<8x32xf32>
    %17 = tpu.matmul %15, %16, %cst_17 {dimension_numbers = #tpu.dot_dimension_numbers<[1], [0], [0], [1], [0, 0, 1, 1], [], []>} : vector<8x64xf32>, vector<64x32xf32>, vector<8x32xf32> -> vector<8x32xf32>
    %c0_18 = arith.constant 0 : index
    %c0_19 = arith.constant 0 : index
    %18 = vector.load %arg8[%c0_18, %c0_19] : memref<1x32xf32, #tpu.memory_space<vmem>>, vector<1x32xf32>
    %19 = vector.broadcast %18 : vector<1x32xf32> to vector<8x32xf32>
    %20 = arith.addf %17, %19 : vector<8x32xf32>
    %cst_20 = arith.constant 0.000000e+00 : f32
    %21 = vector.broadcast %cst_20 : f32 to vector<8x32xf32>
    %22 = arith.maximumf %20, %21 : vector<8x32xf32>
    %c0_21 = arith.constant 0 : index
    %c0_22 = arith.constant 0 : index
    %23 = vector.load %arg9[%c0_21, %c0_22] : memref<8x32xf32, #tpu.memory_space<vmem>>, vector<8x32xf32>
    tpu.vector_store %arg9[%c0_21, %c0_22], %22 {strides = array<i32>} : memref<8x32xf32, #tpu.memory_space<vmem>>, vector<8x32xf32>,
    return
  }
  func.func @transform_0(%arg0: i32) -> (i32, i32) {
    %c0_i32 = arith.constant 0 : i32
    %c0_i32_0 = arith.constant 0 : i32
    return %arg0, %c0_i32 : i32, i32
  }
  func.func @transform_1(%arg0: i32) -> (i32, i32) {
    %c0_i32 = arith.constant 0 : i32
    %c0_i32_0 = arith.constant 0 : i32
    %c0_i32_1 = arith.constant 0 : i32
    return %c0_i32, %c0_i32_0 : i32, i32
  }
  func.func @transform_2(%arg0: i32) -> (i32, i32) {
    %c0_i32 = arith.constant 0 : i32
    %c0_i32_0 = arith.constant 0 : i32
    %c0_i32_1 = arith.constant 0 : i32
    return %c0_i32, %c0_i32_0 : i32, i32
  }
  func.func @transform_3(%arg0: i32) -> (i32, i32) {
    %c0_i32 = arith.constant 0 : i32
    %c0_i32_0 = arith.constant 0 : i32
    %c0_i32_1 = arith.constant 0 : i32
    return %c0_i32, %c0_i32_0 : i32, i32
  }
  func.func @transform_4(%arg0: i32) -> (i32, i32) {
    %c0_i32 = arith.constant 0 : i32
    %c0_i32_0 = arith.constant 0 : i32
    %c0_i32_1 = arith.constant 0 : i32
    return %c0_i32, %c0_i32_0 : i32, i32
  }
  func.func @transform_5(%arg0: i32) -> (i32, i32) {
    %c0_i32 = arith.constant 0 : i32
    %c0_i32_0 = arith.constant 0 : i32
    %c0_i32_1 = arith.constant 0 : i32
    return %c0_i32, %c0_i32_0 : i32, i32
  }
  func.func @transform_6(%arg0: i32) -> (i32, i32) {
    %c0_i32 = arith.constant 0 : i32
    %c0_i32_0 = arith.constant 0 : i32
    %c0_i32_1 = arith.constant 0 : i32
    return %c0_i32, %c0_i32_0 : i32, i32
  }
  func.func @transform_7(%arg0: i32) -> (i32, i32) {
    %c0_i32 = arith.constant 0 : i32
    %c0_i32_0 = arith.constant 0 : i32
    %c0_i32_1 = arith.constant 0 : i32
    return %c0_i32, %c0_i32_0 : i32, i32
  }
  func.func @transform_8(%arg0: i32) -> (i32, i32) {
    %c0_i32 = arith.constant 0 : i32
    %c0_i32_0 = arith.constant 0 : i32
    return %arg0, %c0_i32 : i32, i32
  }
}

</mosaic_0001>

<bundles_post_ra>
// kernel: tpu_custom_call.1
= control target key start
LH: loop header
LB: loop body
LE: loop exit
PB: predicated region body
PF: predicated region fallthrough
CT: control target
= control target key end

     0   :  { %v1074_v3 = vmov 0.0|0.0   ;;  %v1075_v8 = vmov 0.0   ;;  %vm1076_vm0 = vmmov 0   ;;  %vm58_vm1 = vcmask 588800   ;;  %s1512_s0 = inlined_call_operand.vmem [shape: f32[8,72], index: 0, kind: input, shape index: {}]   ;;  %s1513_s1 = inlined_call_operand.vmem [shape: f32[72,288], index: 1, kind: input, shape index: {}]   ;;  %s1514_s2 = inlined_call_operand.vmem [shape: f32[72,288], index: 2, kind: input, shape index: {}]   ;;  %s1515_s3 = inlined_call_operand.vmem [shape: f32[72,64], index: 3, kind: input, shape index: {}]   ;;  %s1516_s4 = inlined_call_operand.vmem [shape: f32[288,64], index: 4, kind: input, shape index: {}]   ;;  %s1517_s5 = inlined_call_operand.vmem [shape: f32[1,64], index: 5, kind: input, shape index: {}]   ;;  %s1518_s6 = inlined_call_operand.vmem [shape: f32[64,32], index: 6, kind: input, shape index: {}]   ;;  %s1519_s7 = inlined_call_operand.vmem [shape: f32[1,32], index: 7, kind: input, shape index: {}]   ;;  %s1520_s8 = inlined_call_operand.hbm [shape: f32[8,32], index: 8, kind: output, shape index: {}]  }
   0x1   :  { %v32_v0 = vld [vmem:[%s1513_s1 + $0x8] sm:$0xff]  ;;  %v35_v1 = vld [vmem:[%s1513_s1 + $0x20] sm:$0xff]  ;;  %v33_v2 = vld [vmem:[%s1513_s1 + $0x10] sm:$0xff]  ;;  %944 = vmatprep.subr.bf16.mxu1 %v1074_v3  ;;  %126 = vmatprep.mubr.f32.mxu0 %v1075_v8 }
   0x2   :  { %v928_v4 = vpack.c.bf16 %v35_v1, %v32_v0  ;;  %v36_v5 = vld [vmem:[%s1513_s1 + $0x28] sm:$0xff]  ;;  %v31_v6 = vld [vmem:[%s1513_s1] sm:$0xff]  ;;  %v34_v7 = vld [vmem:[%s1513_s1 + $0x18] sm:$0xff]  ;;  %853 = vmatprep.mubr.msk.f32.mxu1 %vm1076_vm0, %v1075_v8 }
   0x3   :  { %v945_v9 = vpack.c.bf16 %v36_v5, %v33_v2  ;;  %v930_v10 = vpack.c.bf16 %v34_v7, %v31_v6  ;;  %v38_v11 = vld [vmem:[%s1513_s1 + $0x38] sm:$0xff]  ;;  %v41_v12 = vld [vmem:[%s1513_s1 + $0x50] sm:$0xff]  ;;  %v39_v13 = vld [vmem:[%s1513_s1 + $0x40] sm:$0xff] }
   0x4   :  { %929 = vmatprep.subr.bf16.mxu0 %v928_v4  ;;  %v932_v14 = vpack.c.bf16 %v41_v12, %v38_v11  ;;  %v42_v15 = vld [vmem:[%s1513_s1 + $0x58] sm:$0xff]  ;;  %v37_v16 = vld [vmem:[%s1513_s1 + $0x30] sm:$0xff]  ;;  %v40_v17 = vld [vmem:[%s1513_s1 + $0x48] sm:$0xff] }
   0x5   :  { %946 = vmatpush3.bf16.msra.mxu1 %v945_v9  ;;  %931 = vmatpush1.bf16.msra.mxu0 %v930_v10  ;;  %v948_v18 = vpack.c.bf16 %v42_v15, %v39_v13  ;;  %v934_v19 = vpack.c.bf16 %v40_v17, %v37_v16  ;;  %v44_v20 = vld [vmem:[%s1513_s1 + $0x68] sm:$0xff]  ;;  %v47_v21 = vld [vmem:[%s1513_s1 + $0x80] sm:$0xff]  ;;  %v45_v22 = vld [vmem:[%s1513_s1 + $0x70] sm:$0xff] }
   0x6   :  { %947 = vmatprep.subr.bf16.mxu1 %v1074_v3  ;;  %933 = vmatprep.subr.bf16.mxu0 %v932_v14  ;;  %v936_v23 = vpack.c.bf16 %v47_v21, %v44_v20  ;;  %v48_v24 = vld [vmem:[%s1513_s1 + $0x88] sm:$0xff]  ;;  %v43_v25 = vld [vmem:[%s1513_s1 + $0x60] sm:$0xff]  ;;  %v46_v26 = vld [vmem:[%s1513_s1 + $0x78] sm:$0xff] }
   0x7   :  { %v50_v27 = vld [vmem:[%s1513_s1 + $0x98] sm:$0xff]  ;;  %v53_v28 = vld [vmem:[%s1513_s1 + $0xb0] sm:$0xff]  ;;  %v951_v29 = vpack.c.bf16 %v48_v24, %v45_v22  ;;  %v938_v30 = vpack.c.bf16 %v46_v26, %v43_v25  ;;  %v51_v31 = vld [vmem:[%s1513_s1 + $0xa0] sm:$0xff] }
   0x8   :  { %v940_v32 = vpack.c.bf16 %v53_v28, %v50_v27  ;;  %v54_v33 = vld [vmem:[%s1513_s1 + $0xb8] sm:$0xff]  ;;  %v49_v34 = vld [vmem:[%s1513_s1 + $0x90] sm:$0xff]  ;;  %v52_v35 = vld [vmem:[%s1513_s1 + $0xa8] sm:$0xff] }
   0x9   :  { %949 = vmatpush3.bf16.msra.mxu1 %v948_v18  ;;  %935 = vmatpush1.bf16.msra.mxu0 %v934_v19  ;;  %v954_v36 = vpack.c.bf16 %v54_v33, %v51_v31  ;;  %v942_v37 = vpack.c.bf16 %v52_v35, %v49_v34  ;;  %v56_v38 = vld [vmem:[%s1513_s1 + $0xc8] sm:$0xff]  ;;  %v57_v39 = vld [vmem:[%s1513_s1 + $0xd0] sm:$0xff]  ;;  %v207_v41 = vld [vmem:[%s1514_s2 + $0x20] sm:$0xff] }
   0xa   :  { %950 = vmatprep.subr.bf16.mxu1 %v1074_v3  ;;  %937 = vmatprep.subr.bf16.mxu0 %v936_v23  ;;  %v204_v40 = vld [vmem:[%s1514_s2 + $0x8] sm:$0xff]  ;;  %v205_v42 = vld [vmem:[%s1514_s2 + $0x10] sm:$0xff]  ;;  %v203_v44 = vld [vmem:[%s1514_s2] sm:$0xff] }
   0xb   :  { %v208_v43 = vld [vmem:[%s1514_s2 + $0x28] sm:$0xff]  ;;  %v206_v45 = vld [vmem:[%s1514_s2 + $0x18] sm:$0xff]  ;;  %v55_v46 = vld [vmem:[%s1513_s1 + $0xc0] sm:$0xff]  ;;  %v956_v50 = vpack.c.bf16 %v207_v41, %v204_v40 }
   0xc   :  { %v210_v47 = vld [vmem:[%s1514_s2 + $0x38] sm:$0xff]  ;;  %v213_v48 = vld [vmem:[%s1514_s2 + $0x50] sm:$0xff]  ;;  %v1239_v49 = vld [vmem:[%s1512_s0] sm:$0xff]  ;;  %v973_v51 = vpack.c.bf16 %v208_v43, %v205_v42  ;;  %v958_v52 = vpack.c.bf16 %v206_v45, %v203_v44 }
   0xd   :  { %952 = vmatpush3.bf16.msra.mxu1 %v951_v29  ;;  %939 = vmatpush1.bf16.msra.mxu0 %v938_v30  ;;  %v211_v53 = vld [vmem:[%s1514_s2 + $0x40] sm:$0xff]  ;;  %v960_v54 = vpack.c.bf16 %v213_v48, %v210_v47  ;;  %v214_v55 = vld [vmem:[%s1514_s2 + $0x58] sm:$0xff]  ;;  %v209_v56 = vld [vmem:[%s1514_s2 + $0x30] sm:$0xff] }
   0xe   :  { %953 = vmatprep.subr.bf16.mxu1 %v1074_v3  ;;  %941 = vmatprep.subr.bf16.mxu0 %v940_v32  ;;  %v212_v57 = vld [vmem:[%s1514_s2 + $0x48] sm:$0xff]  ;;  %v219_v59 = vld [vmem:[%s1514_s2 + $0x80] sm:$0xff] }
   0xf   :  { %v216_v58 = vld [vmem:[%s1514_s2 + $0x68] sm:$0xff] }
  0x11   :  { %955 = vmatpush3.bf16.msra.mxu1 %v954_v36  ;;  %943 = vmatpush1.bf16.msra.mxu0 %v942_v37 }
  0x12   :  { %851 = vmatprep.subr.mxu1 %v1075_v8  ;;  %78 = vmatprep.subr.mxu0 %v56_v38 }
  0x15   :  { %852 = vmatpush3.msra.mxu1 %v57_v39  ;;  %79 = vmatpush1.msra.mxu0 %v55_v46 }
  0x16   :  { %972 = vmatprep.subr.bf16.mxu1 %v1074_v3  ;;  %747 = vmatmul.mubr.msk.f32.vlgmr.msra.gmra.mrb[0].mxu0 %vm58_vm1, %v1239_v49 }
  0x17   :  { %854 = vmatmul.mubr.msk.f32.vlgmr.msra.gmra.mrb[0].mxu1 %vm58_vm1, %v1239_v49  ;;  %957 = vmatprep.subr.bf16.mxu0 %v956_v50 }
  0x18   :  { %13 = vsyncpa [#allocation3], 0  ;;  %974 = vmatpush3.bf16.msra.mxu1 %v973_v51  ;;  %959 = vmatpush1.bf16.msra.mxu0 %v958_v52  ;;  %v976_v60 = vpack.c.bf16 %v214_v55, %v211_v53  ;;  %v962_v61 = vpack.c.bf16 %v212_v57, %v209_v56  ;;  %v217_v62 = vld [vmem:[%s1514_s2 + $0x70] sm:$0xff]  ;;  %v964_v63 = vpack.c.bf16 %v219_v59, %v216_v58  ;;  %v220_v0 = vld [vmem:[%s1514_s2 + $0x88] sm:$0xff]  ;;  %vm419_vm2 = vcmask 261120  }
  0x19   :  { %975 = vmatprep.subr.bf16.mxu1 %v1074_v3  ;;  %961 = vmatprep.subr.bf16.mxu0 %v960_v54  ;;  %v215_v1 = vld [vmem:[%s1514_s2 + $0x60] sm:$0xff]  ;;  %v218_v2 = vld [vmem:[%s1514_s2 + $0x78] sm:$0xff]  ;;  %v225_v5 = vld [vmem:[%s1514_s2 + $0xb0] sm:$0xff]  ;;  %v979_v6 = vpack.c.bf16 %v220_v0, %v217_v62  ;;  %vm657_vm3 = vcmask 523264  }
  0x1a   :  { %v222_v4 = vld [vmem:[%s1514_s2 + $0x98] sm:$0xff]  ;;  %874 = vmatprep.mubr.msk.f32.mxu1 %vm1076_vm0, %v1075_v8  ;;  %294 = vmatprep.mubr.f32.mxu0 %v1075_v8  ;;  %v966_v7 = vpack.c.bf16 %v218_v2, %v215_v1  ;;  %v223_v9 = vld [vmem:[%s1514_s2 + $0xa0] sm:$0xff]  ;;  %v221_v12 = vld [vmem:[%s1514_s2 + $0x90] sm:$0xff] }
  0x1b   :  { %v968_v10 = vpack.c.bf16 %v225_v5, %v222_v4  ;;  %v226_v11 = vld [vmem:[%s1514_s2 + $0xb8] sm:$0xff]  ;;  %v224_v13 = vld [vmem:[%s1514_s2 + $0xa8] sm:$0xff]  ;;  %v399_v17 = vld [vmem:[%s1516_s4 + $0x80] sm:$0xff] }
  0x1c   :  { %977 = vmatpush3.bf16.msra.mxu1 %v976_v60  ;;  %963 = vmatpush1.bf16.msra.mxu0 %v962_v61  ;;  %v982_v14 = vpack.c.bf16 %v226_v11, %v223_v9  ;;  %v970_v15 = vpack.c.bf16 %v224_v13, %v221_v12  ;;  %v228_v16 = vld [vmem:[%s1514_s2 + $0xc8] sm:$0xff]  ;;  %v229_v19 = vld [vmem:[%s1514_s2 + $0xd0] sm:$0xff]  ;;  %v383_v20 = vld [vmem:[%s1516_s4] sm:$0xff] }
  0x1d   :  { %978 = vmatprep.subr.bf16.mxu1 %v1074_v3  ;;  %965 = vmatprep.subr.bf16.mxu0 %v964_v63  ;;  %v400_v18 = vld [vmem:[%s1516_s4 + $0x88] sm:$0xff]  ;;  %v227_v22 = vld [vmem:[%s1514_s2 + $0xc0] sm:$0xff]  ;;  %v401_v23 = vld [vmem:[%s1516_s4 + $0x90] sm:$0xff] }
  0x1e   :  { %v384_v21 = vld [vmem:[%s1516_s4 + $0x8] sm:$0xff]  ;;  %v402_v24 = vld [vmem:[%s1516_s4 + $0x98] sm:$0xff]  ;;  %v984_v25 = vpack.c.bf16 %v400_v18, %v399_v17  ;;  %v385_v28 = vld [vmem:[%s1516_s4 + $0x10] sm:$0xff] }
  0x1f   :  { %v986_v26 = vpack.c.bf16 %v384_v21, %v383_v20  ;;  %v988_v27 = vpack.c.bf16 %v402_v24, %v401_v23  ;;  %v386_v29 = vld [vmem:[%s1516_s4 + $0x18] sm:$0xff]  ;;  %v403_v30 = vld [vmem:[%s1516_s4 + $0xa0] sm:$0xff]  ;;  %v404_v31 = vld [vmem:[%s1516_s4 + $0xa8] sm:$0xff] }
  0x20   :  { %980 = vmatpush3.bf16.msra.mxu1 %v979_v6  ;;  %967 = vmatpush1.bf16.msra.mxu0 %v966_v7  ;;  %v990_v32 = vpack.c.bf16 %v386_v29, %v385_v28  ;;  %v992_v33 = vpack.c.bf16 %v404_v31, %v403_v30  ;;  %v387_v34 = vld [vmem:[%s1516_s4 + $0x20] sm:$0xff]  ;;  %v388_v35 = vld [vmem:[%s1516_s4 + $0x28] sm:$0xff]  ;;  %v405_v37 = vld [vmem:[%s1516_s4 + $0xb0] sm:$0xff] }
  0x21   :  { %981 = vmatprep.subr.bf16.mxu1 %v1074_v3  ;;  %969 = vmatprep.subr.bf16.mxu0 %v968_v10  ;;  %v994_v36 = vpack.c.bf16 %v388_v35, %v387_v34  ;;  %v406_v38 = vld [vmem:[%s1516_s4 + $0xb8] sm:$0xff]  ;;  %v389_v39 = vld [vmem:[%s1516_s4 + $0x30] sm:$0xff]  ;;  %v407_v42 = vld [vmem:[%s1516_s4 + $0xc0] sm:$0xff] }
  0x22   :  { %v996_v40 = vpack.c.bf16 %v406_v38, %v405_v37  ;;  %v390_v41 = vld [vmem:[%s1516_s4 + $0x38] sm:$0xff]  ;;  %v408_v43 = vld [vmem:[%s1516_s4 + $0xc8] sm:$0xff]  ;;  %v391_v46 = vld [vmem:[%s1516_s4 + $0x40] sm:$0xff] }
  0x23   :  { %v998_v44 = vpack.c.bf16 %v390_v41, %v389_v39  ;;  %v1000_v45 = vpack.c.bf16 %v408_v43, %v407_v42  ;;  %v392_v47 = vld [vmem:[%s1516_s4 + $0x48] sm:$0xff]  ;;  %v409_v48 = vld [vmem:[%s1516_s4 + $0xd0] sm:$0xff]  ;;  %v410_v50 = vld [vmem:[%s1516_s4 + $0xd8] sm:$0xff] }
  0x24   :  { %983 = vmatpush3.bf16.msra.mxu1 %v982_v14  ;;  %971 = vmatpush1.bf16.msra.mxu0 %v970_v15  ;;  %v1002_v51 = vpack.c.bf16 %v392_v47, %v391_v46  ;;  %v374_v52 = vld [vmem:[%s1515_s3] sm:$0xff]  ;;  %v1004_v53 = vpack.c.bf16 %v410_v50, %v409_v48  ;;  %v393_v54 = vld [vmem:[%s1516_s4 + $0x50] sm:$0xff]  ;;  %v394_v55 = vld [vmem:[%s1516_s4 + $0x58] sm:$0xff] }
  0x25   :  { %872 = vmatprep.subr.mxu1 %v1075_v8  ;;  %246 = vmatprep.subr.mxu0 %v228_v16  ;;  %v375_v56 = vld [vmem:[%s1515_s3 + $0x8] sm:$0xff]  ;;  %v411_v57 = vld [vmem:[%s1516_s4 + $0xe0] sm:$0xff]  ;;  %v1006_v60 = vpack.c.bf16 %v394_v55, %v393_v54  ;;  %v413_v1 = vld [vmem:[%s1516_s4 + $0xf0] sm:$0xff] }
  0x26   :  { %v412_v58 = vld [vmem:[%s1516_s4 + $0xe8] sm:$0xff]  ;;  %v1023_v59 = vpack.c.bf16 %v375_v56, %v374_v52  ;;  %v395_v62 = vld [vmem:[%s1516_s4 + $0x60] sm:$0xff]  ;;  %v414_v2 = vld [vmem:[%s1516_s4 + $0xf8] sm:$0xff] }
  0x27   :  { %v1008_v61 = vpack.c.bf16 %v412_v58, %v411_v57  ;;  %v396_v63 = vld [vmem:[%s1516_s4 + $0x68] sm:$0xff]  ;;  %v376_v4 = vld [vmem:[%s1515_s3 + $0x10] sm:$0xff]  ;;  %v1012_v5 = vpack.c.bf16 %v414_v2, %v413_v1  ;;  %v377_v6 = vld [vmem:[%s1515_s3 + $0x18] sm:$0xff] }
  0x28   :  { %873 = vmatpush3.msra.mxu1 %v229_v19  ;;  %247 = vmatpush1.msra.mxu0 %v227_v22  ;;  %v1010_v0 = vpack.c.bf16 %v396_v63, %v395_v62  ;;  %v397_v7 = vld [vmem:[%s1516_s4 + $0x70] sm:$0xff]  ;;  %v398_v9 = vld [vmem:[%s1516_s4 + $0x78] sm:$0xff]  ;;  %v1026_v10 = vpack.c.bf16 %v377_v6, %v376_v4  ;;  %v378_v12 = vld [vmem:[%s1515_s3 + $0x20] sm:$0xff] }
  0x29   :  { %875 = vmatmul.mubr.msk.f32.vlgmr.msra.gmra.mrb[2].mxu1 %vm58_vm1, %v1239_v49  ;;  %749 = vmatmul.mubr.msk.f32.vlgmr.msra.gmra.mrb[2].mxu0 %vm58_vm1, %v1239_v49  ;;  %v1014_v11 = vpack.c.bf16 %v398_v9, %v397_v7  ;;  %v379_v13 = vld [vmem:[%s1515_s3 + $0x28] sm:$0xff]  ;;  %v380_v15 = vld [vmem:[%s1515_s3 + $0x30] sm:$0xff]  ;;  %v381_v16 = vld [vmem:[%s1515_s3 + $0x38] sm:$0xff] }
  0x2a   :  { %985 = vmatprep.subr.bf16.mxu0 %v984_v25  ;;  %1022 = vmatprep.subr.bf16.mxu1 %v1074_v3  ;;  %v1029_v14 = vpack.c.bf16 %v379_v13, %v378_v12  ;;  %v1032_v17 = vpack.c.bf16 %v381_v16, %v380_v15  ;;  %v382_v18 = vld [vmem:[%s1515_s3 + $0x40] sm:$0xff]  ;;  %v416_v24 = vld [vmem:[%s1516_s4 + $0x108] sm:$0xff]  ;;  %v645_v38 = vld [vmem:[%s1518_s6 + $0x18] sm:$0xff] }
  0x2b   :  { %987 = vmatpush3.bf16.msra.mxu0 %v986_v26  ;;  %906 = vmatprep.mubr.msk.f32.mxu1 %vm1076_vm0, %v1075_v8  ;;  %v415_v23 = vld [vmem:[%s1516_s4 + $0x100] sm:$0xff]  ;;  %v647_v41 = vld [vmem:[%s1518_s6 + $0x28] sm:$0xff]  ;;  %v649_v46 = vld [vmem:[%s1518_s6 + $0x38] sm:$0xff] }
  0x2c   :  { %989 = vmatprep.subr.bf16.mxu0 %v988_v27  ;;  %1024 = vmatpush3.bf16.msra.mxu1 %v1023_v59  ;;  %v1017_v31 = vpack.c.bf16 %v416_v24, %v415_v23  ;;  %v642_v35 = vld [vmem:[%s1518_s6] sm:$0xff] }
  0x2d   :  { %1025 = vmatprep.subr.bf16.mxu1 %v1074_v3  ;;  %v754_v58 = vld [vmem:[%s1519_s7] ss:$0 sm:$0xff] }
  0x2f   :  { %991 = vmatpush3.bf16.msra.mxu0 %v990_v32  ;;  %v417_v32 = vld [vmem:[%s1516_s4 + $0x110] sm:$0xff] }
  0x30   :  { %993 = vmatprep.subr.bf16.mxu0 %v992_v33  ;;  %1027 = vmatpush3.bf16.msra.mxu1 %v1026_v10  ;;  %v418_v33 = vld [vmem:[%s1516_s4 + $0x118] sm:$0xff] }
  0x31   :  { %1028 = vmatprep.subr.bf16.mxu1 %v1074_v3  ;;  %v1020_v34 = vpack.c.bf16 %v418_v33, %v417_v32 }
  0x33   :  { %995 = vmatpush3.bf16.msra.mxu0 %v994_v36  ;;  %v643_v36 = vld [vmem:[%s1518_s6 + $0x8] sm:$0xff] }
  0x34   :  { %997 = vmatprep.subr.bf16.mxu0 %v996_v40  ;;  %1030 = vmatpush3.bf16.msra.mxu1 %v1029_v14  ;;  %v1035_v37 = vpack.c.bf16 %v643_v36, %v642_v35  ;;  %v646_v40 = vld [vmem:[%s1518_s6 + $0x20] sm:$0xff] }
  0x35   :  { %1031 = vmatprep.subr.bf16.mxu1 %v1074_v3  ;;  %v1041_v42 = vpack.c.bf16 %v647_v41, %v646_v40 }
  0x37   :  { %999 = vmatpush3.bf16.msra.mxu0 %v998_v44 }
  0x38   :  { %1001 = vmatprep.subr.bf16.mxu0 %v1000_v45  ;;  %1033 = vmatpush3.bf16.msra.mxu1 %v1032_v17  ;;  %v648_v45 = vld [vmem:[%s1518_s6 + $0x30] sm:$0xff] }
  0x39   :  { %904 = vmatprep.subr.mxu1 %v1075_v8  ;;  %v1044_v47 = vpack.c.bf16 %v649_v46, %v648_v45 }
  0x3b   :  { %1003 = vmatpush3.bf16.msra.mxu0 %v1002_v51 }
  0x3c   :  { %1005 = vmatprep.subr.bf16.mxu0 %v1004_v53  ;;  %905 = vmatpush3.msra.mxu1 %v382_v18 }
  0x3d   :  { %907 = vmatmul.mubr.msk.f32.vlgmr.msra.gmra.mrb[4].mxu1 %vm58_vm1, %v1239_v49  ;;  %1034 = vmatprep.subr.bf16.mxu1 %v1074_v3 }
  0x3e   :  { %925 = vmatprep.mubr.msk.f32.mxu1 %vm1076_vm0, %v1075_v8  ;;  %1036 = vmatpush3.bf16.msra.mxu1 %v1035_v37 }
  0x3f   :  { %1007 = vmatpush3.bf16.msra.mxu0 %v1006_v60  ;;  %1037 = vmatprep.subr.bf16.mxu1 %v1074_v3 }
  0x40   :  { %1009 = vmatprep.subr.bf16.mxu0 %v1008_v61 }
  0x43   :  { %1011 = vmatpush3.bf16.msra.mxu0 %v1010_v0 }
  0x44   :  { %1013 = vmatprep.subr.bf16.mxu0 %v1012_v5 }
  0x47   :  { %1015 = vmatpush3.bf16.msra.mxu0 %v1014_v11 }
  0x48   :  { %1016 = vmatprep.subr.bf16.mxu0 %v1074_v3 }
  0xe9   :  { %v128_v19 = vpop.f32.mrb[0].mxu0 }
  0xea   :  { %v130_v20 = vpop.f32.mrb[1].mxu0  ;;  %v199_v21 = vpop.f32.mrb[0].mxu1 }
  0xeb   :  { %v855_v22 = vpop.f32.mrb[1].mxu1 }
  0xfc   :  { %v367_v25 = vpop.f32.mrb[2].mxu1  ;;  %v296_v26 = vpop.f32.mrb[2].mxu0 }
  0xfd   :  { %v373_v49 = vmul.f32 %v367_v25, %v199_v21  ;;  %v371_v27 = vmul.f32 %v296_v26, %v128_v19  ;;  %v298_v28 = vpop.f32.mrb[3].mxu0  ;;  %v876_v29 = vpop.f32.mrb[3].mxu1 }
  0xfe   :  { %v372_v30 = vmul.f32 %v298_v28, %v130_v20 }
 0x100   :  { %487 = vmatprep.mubr.f32.mxu0 %v372_v30 }
 0x101   :  { %488 = vmatmul.mubr.f32.vlgmr.msra.gmra.mrb[4].mxu0 %v371_v27 }
 0x102   :  { %1018 = vmatpush3.bf16.msra.mxu0 %v1017_v31  ;;  %885 = vmatprep.mubr.msk.f32.mxu0 %vm1076_vm0, %v1075_v8  ;;  %v644_v8 = vld [vmem:[%s1518_s6 + $0x10] sm:$0xff]  ;;  %s1077_s6 = smov [#allocation2]  }
 0x103   :  { %1019 = vmatprep.subr.bf16.mxu0 %v1074_v3  ;;  %v1038_v39 = vpack.c.bf16 %v645_v38, %v644_v8  ;;  %s739_s9 = sshll.u32 %s1077_s6, 4  ;;  %s740_s9 = int_to_ptr.vmem [resolvable:$true] %s739_s9 }
 0x104   :  { %s1050_s10 = scalar_lea.vmem %s740_s9, 128  ;;  %p1055_p1 = scmp.lt.s32.totalorder %s740_s9, %s740_s9 }
 0x105   :  { %1039 = vmatpush3.bf16.msra.mxu1 %v1038_v39  ;;  %p1051_p0 = scmp.ne.s32.totalorder %s740_s9, %s1050_s10  ;;  %p1056_p2 = scmp.lt.s32.totalorder %s1050_s10, %s1050_s10 }
 0x106   :  { %1021 = vmatpush3.bf16.msra.mxu0 %v1020_v34  ;;  %1040 = vmatprep.subr.bf16.mxu1 %v1074_v3 }
 0x107   :  { %p1057_p3 = por %p1056_p2, %p1055_p1 }
 0x109   :  { %886 = vmatmul.mubr.msk.f32.vlgmr.msra.gmra.mrb[6].mxu0 %vm419_vm2, %v373_v49  ;;  %1042 = vmatpush3.bf16.msra.mxu1 %v1041_v42  ;;  %p1058_p4 = pnand %p1057_p3, %p1051_p0 }
 0x10a   :  { %1043 = vmatprep.subr.bf16.mxu1 %v1074_v3  ;;  %v753_v3 = vld [vmem:[%s1517_s5] ss:$0 sm:$0xff] }
 0x10d   :  { %1045 = vmatpush3.bf16.msra.mxu1 %v1044_v47 }
 0x110   :  { %v629_v43 = vpop.f32.mrb[4].mxu1 }
 0x111   :  { %v908_v44 = vpop.f32.mrb[5].mxu1 }
 0x1d4   :  { %v808_v48 = vpop.f32.mrb[4].mxu0 }
 0x1d5   :  { %v809_v50 = vpop.f32.mrb[5].mxu0 }
 0x1d6   :  { %v810_v51 = vadd.f32 %v809_v50, %v808_v48 }
 0x1dc   :  { %v559_v52 = vpop.f32.mrb[6].mxu0 }
 0x1dd   :  { %v560_v53 = vadd.f32 %v810_v51, %v559_v52  ;;  %v887_v54 = vpop.f32.mrb[7].mxu0 }
 0x1df   :  { %v630_v55 = vadd.f32 %v629_v43, %v560_v53 }
 0x1e1   :  { %v640_v56 = vadd.f32 %v753_v3, %v630_v55 }
 0x1e3   :  { %v641_v57 = vmax.f32 %v640_v56, 0.0 }
 0x1e5   :  { %926 = vmatmul.mubr.msk.f32.vlgmr.msra.gmra.mrb[6].mxu1 %vm657_vm3, %v641_v57 }
 0x2b8   :  { %v727_v59 = vpop.f32.mrb[6].mxu1 }
 0x2b9   :  { %v728_v60 = vadd.f32 %v754_v58, %v727_v59  ;;  %v927_v61 = vpop.f32.mrb[7].mxu1 }
 0x2bb   :  { %v731_v62 = vmax.f32 %v728_v60, 0.0 }
 0x2bd   :  { %732 = vst.msk [vmem:[#allocation2] sm:$0xff] %vm419_vm2, %v731_v62 }
 0x2be   :  { %1061 = shalt.err (!%p1058_p4)
}
 0x2bf   :  { %s1062_s7 = scalar_lea.hbm %s1520_s8, 128 }
 0x2c0   :  { %p1063_p5 = scmp.ne.s32.totalorder %s1520_s8, %s1062_s7  ;;  %p1066_p6 = scmp.lt.u32.totalorder %s1062_s7, %s1520_s8 }
 0x2c2   :  { %p1068_p7 = pnand %p1066_p6, %p1063_p5 }
 0x2c4   :  { %1071 = shalt.err (!%p1068_p7)
}
 0x2c5   :  { %742 = dma.vmem_to_hbm [thread:$0]  %s740_s9, 128, %s1520_s8, [#allocation3]  }
 0x2c6   :  { %1072 = dma.done.wait [#allocation3], 128  }
 0x2c7   :  { %1073 = vsyncadd [#allocation3], 4294967168 }
 0x2c8   :  { %746 = vsyncpa [#allocation3], 1 }

</bundles_post_ra>
